<compile_context>
chip_gen: v6e
topology: v6e:2x2x1
jax: 0.10.0
libtpu: 0.0.40
codegen_flags: <defaults>
</compile_context>

<pallas_src>
import functools

import jax
import jax.numpy as jnp
from jax.experimental import pallas as pl
from jax.experimental.pallas import tpu as pltpu


def _round_up(x, m):
    return ((x + m - 1) // m) * m


def mcts_fused_kernel(n_actions, state_ref, w1_ref, b1_ref, wh_ref, bh_ref,
                      out_ref):
    # state tile (TB, H) f32 -> bf16 for the MXU; accumulate in f32.
    x = state_ref[...].astype(jnp.bfloat16)

    # hidden = relu(state @ W1 + b1), lane-dense (TB, HP)
    h = jnp.dot(x, w1_ref[...], preferred_element_type=jnp.float32) + b1_ref[...]
    h = jnp.maximum(h, 0.0)

    # fused heads: z[:, :A] = policy logits, z[:, A] = value pre-activation,
    # z[:, A+1:] = zero-padded lanes (weights/bias zero-padded in the wrapper).
    z = (jnp.dot(h.astype(jnp.bfloat16), wh_ref[...],
                 preferred_element_type=jnp.float32) + bh_ref[...])

    TB, AP = z.shape
    col = jax.lax.broadcasted_iota(jnp.int32, z.shape, 1)
    is_pol = col < n_actions

    # masked, max-stabilized softmax over the first n_actions lanes only.
    # exp is taken on the masked logits so padded lanes give exp(-inf) = 0
    # (no overflow possible regardless of the real logits' magnitude).
    masked = jnp.where(is_pol, z, -jnp.inf)
    m = jnp.max(masked, axis=1, keepdims=True)
    e = jnp.exp(masked - m)
    inv = pl.reciprocal(jnp.sum(e, axis=1, keepdims=True), approx=False)
    pol_out = e * inv                              # zero on all non-policy lanes

    # tanh only on the 128-lane block holding the value column (EUP economy).
    v_lo = (n_actions // 128) * 128
    v_hi = v_lo + 128
    zv = z[:, v_lo:v_hi]                           # static, vreg-aligned slice
    colv = jax.lax.broadcasted_iota(jnp.int32, zv.shape, 1)
    val_blk = jnp.where(colv == (n_actions - v_lo), jnp.tanh(zv),
                        pol_out[:, v_lo:v_hi])

    pieces = []
    if v_lo > 0:
        pieces.append(pol_out[:, :v_lo])
    pieces.append(val_blk)
    if v_hi < AP:
        pieces.append(pol_out[:, v_hi:])
    out = pieces[0] if len(pieces) == 1 else jnp.concatenate(pieces, axis=1)

    out_ref[...] = out.astype(out_ref.dtype)       # single lane-dense (TB, AP) store


def _mcts_forward_xla(state, w1, b1, wp, bp, wv, bv):
    """Plain fused-XLA path for tiny problems (fixed Pallas overhead dominates)."""
    h = jnp.maximum(state @ w1 + b1, 0.0)
    policy = jax.nn.softmax(h @ wp + bp, axis=1)
    value = jnp.tanh(h @ wv + bv)
    return policy, value


def mcts_forward(state, w1, b1, wp, bp, wv, bv, *, block_b=512,
                 force_pallas=False):
    B, H = state.shape
    A = wp.shape[1]

    # Tiny problems: the kernel is pure fixed overhead -> let XLA fuse it.
    if not force_pallas and B * H < (1 << 14):
        return _mcts_forward_xla(state, w1, b1, wp, bp, wv, bv)

    HP = _round_up(H, 128)         # lane-dense hidden width
    AP = _round_up(A + 1, 128)     # lane-dense fused-head width

    # bf16 MXU-native weights; biases stay f32 (tiny, added post-accumulation).
    w1_p = jnp.pad(w1, ((0, 0), (0, HP - H))).astype(jnp.bfloat16)          # (H, HP)
    b1_p = jnp.pad(b1, ((0, 0), (0, HP - H)))                                # (1, HP)
    w_head = jnp.pad(jnp.concatenate([wp, wv], axis=1),
                     ((0, HP - H), (0, AP - (A + 1)))).astype(jnp.bfloat16)  # (HP, AP)
    b_head = jnp.pad(jnp.concatenate([bp, bv], axis=1),
                     ((0, 0), (0, AP - (A + 1))))                            # (1, AP)

    # Batch tile: multiple of 8, at most block_b rows. No pre-padding of state:
    # Pallas masks the ragged boundary block (rows are independent here).
    # TODO(synk): on v7x (64 MiB VMEM/TC) re-derive block_b from the replicated
    # weight footprint; 512 is sized for v6e.
    TB = _round_up(min(block_b, _round_up(B, 8)), 8)
    grid_b = pl.cdiv(B, TB)

    # Explicit scoped-VMEM budget (double-buffered inputs/outputs) + headroom.
    bytes_needed = (
        2 * TB * H * 4        # state tiles (f32)
        + 2 * H * HP * 2      # W1 (bf16)
        + 2 * 8 * HP * 4      # b1 (f32, sublane-padded)
        + 2 * HP * AP * 2     # fused head W (bf16)
        + 2 * 8 * AP * 4      # fused head b (f32)
        + 2 * TB * AP * 4     # output slab (f32)
    )
    vmem_limit = int(min(bytes_needed + (16 << 20), 64 << 20))

    out = pl.pallas_call(
        functools.partial(mcts_fused_kernel, A),
        out_shape=jax.ShapeDtypeStruct((B, AP), jnp.float32),
        grid=(grid_b,),
        in_specs=[
            pl.BlockSpec((TB, H), lambda i: (i, 0)),    # state (tiled over batch)
            pl.BlockSpec((H, HP), lambda i: (0, 0)),    # W1     (VMEM-resident)
            pl.BlockSpec((1, HP), lambda i: (0, 0)),    # b1
            pl.BlockSpec((HP, AP), lambda i: (0, 0)),   # fused head W
            pl.BlockSpec((1, AP), lambda i: (0, 0)),    # fused head b
        ],
        out_specs=pl.BlockSpec((TB, AP), lambda i: (i, 0)),
        compiler_params=pltpu.CompilerParams(
            dimension_semantics=("parallel",),          # batch tiles are independent
            vmem_limit_bytes=vmem_limit),
    )(state, w1_p, b1_p, w_head, b_head)

    policy = out[:, :A]
    value = out[:, A:A + 1]
    return policy, value


def init_params(key, hid_dim, n_actions):
    """Deterministic PyTorch-style uniform(-1/sqrt(fan_in), 1/sqrt(fan_in)) init."""
    ks = jax.random.split(key, 6)
    bound_h = 1.0 / jnp.sqrt(hid_dim)
    w1 = jax.random.uniform(ks[0], (hid_dim, hid_dim), jnp.float32, -bound_h, bound_h)
    b1 = jax.random.uniform(ks[1], (1, hid_dim), jnp.float32, -bound_h, bound_h)
    wp = jax.random.uniform(ks[2], (hid_dim, n_actions), jnp.float32, -bound_h, bound_h)
    bp = jax.random.uniform(ks[3], (1, n_actions), jnp.float32, -bound_h, bound_h)
    wv = jax.random.uniform(ks[4], (hid_dim, 1), jnp.float32, -bound_h, bound_h)
    bv = jax.random.uniform(ks[5], (1, 1), jnp.float32, -bound_h, bound_h)
    return w1, b1, wp, bp, wv, bv


if __name__ == "__main__":
    B, HID, N_ACTIONS = 8, 32, 2

    key = jax.random.PRNGKey(0)
    k_state, k_params = jax.random.split(key)

    state = jax.random.normal(k_state, (B, HID), jnp.float32)
    params = init_params(k_params, HID, N_ACTIONS)

    fwd = jax.jit(functools.partial(mcts_forward, force_pallas=True))
    policy, value = fwd(state, *params)
    jax.block_until_ready((policy, value))

    # Pure-JAX reference mirroring the kernel's bf16-weight / f32-accumulate math.
    w1, b1, wp, bp, wv, bv = params
    s_bf = state.astype(jnp.bfloat16)
    h_ref = jnp.maximum(
        jnp.dot(s_bf, w1.astype(jnp.bfloat16), preferred_element_type=jnp.float32) + b1, 0.0)
    h_bf = h_ref.astype(jnp.bfloat16)
    policy_ref = jax.nn.softmax(
        jnp.dot(h_bf, wp.astype(jnp.bfloat16), preferred_element_type=jnp.float32) + bp, axis=1)
    value_ref = jnp.tanh(
        jnp.dot(h_bf, wv.astype(jnp.bfloat16), preferred_element_type=jnp.float32) + bv)

    # Full-precision f32 reference (loose tolerance, guards against gross errors).
    h32 = jnp.maximum(state @ w1 + b1, 0.0)
    policy_f32 = jax.nn.softmax(h32 @ wp + bp, axis=1)
    value_f32 = jnp.tanh(h32 @ wv + bv)

    assert policy.shape == (B, N_ACTIONS) and value.shape == (B, 1)
    assert jnp.allclose(policy, policy_ref, atol=2e-3), "policy mismatch (bf16 ref)"
    assert jnp.allclose(value, value_ref, atol=2e-3), "value mismatch (bf16 ref)"
    assert jnp.allclose(policy, policy_f32, atol=5e-2), "policy mismatch (f32 ref)"
    assert jnp.allclose(value, value_f32, atol=5e-2), "value mismatch (f32 ref)"
    assert jnp.allclose(jnp.sum(policy, axis=1), 1.0, atol=1e-3), "softmax not normalized"

    print("KERNEL_OK")
</pallas_src>

<mosaic_0001>
module attributes {stable_mosaic.version = 11 : i64} {
  func.func @mcts_fused_kernel(%arg0: i32, %arg1: memref<8x32xf32, #tpu.memory_space<vmem>>, %arg2: memref<32x128xbf16, #tpu.memory_space<vmem>>, %arg3: memref<1x128xf32, #tpu.memory_space<vmem>>, %arg4: memref<128x128xbf16, #tpu.memory_space<vmem>>, %arg5: memref<1x128xf32, #tpu.memory_space<vmem>>, %arg6: memref<8x128xf32, #tpu.memory_space<vmem>>) attributes {dimension_semantics = [#tpu.dimension_semantics<parallel>], iteration_bounds = array<i64: 1>, scalar_prefetch = 0 : i64, scratch_operands = 0 : i64, tpu.core_type = #tpu.core_type<tc>, window_params = [{transform_indices = @transform_0, window_bounds = array<i64: 8, 32>}, {pipeline_mode = #tpu.pipeline_mode<synchronous>, transform_indices = @transform_1, window_bounds = array<i64: 32, 128>}, {pipeline_mode = #tpu.pipeline_mode<synchronous>, transform_indices = @transform_2, window_bounds = array<i64: 1, 128>}, {pipeline_mode = #tpu.pipeline_mode<synchronous>, transform_indices = @transform_3, window_bounds = array<i64: 128, 128>}, {pipeline_mode = #tpu.pipeline_mode<synchronous>, transform_indices = @transform_4, window_bounds = array<i64: 1, 128>}, {transform_indices = @transform_5, window_bounds = array<i64: 8, 128>}]} {
    %c0 = arith.constant 0 : index
    %c0_0 = arith.constant 0 : index
    %0 = vector.load %arg1[%c0, %c0_0] : memref<8x32xf32, #tpu.memory_space<vmem>>, vector<8x32xf32>
    %1 = arith.truncf %0 : vector<8x32xf32> to vector<8x32xbf16>
    %c0_1 = arith.constant 0 : index
    %c0_2 = arith.constant 0 : index
    %2 = vector.load %arg2[%c0_1, %c0_2] : memref<32x128xbf16, #tpu.memory_space<vmem>>, vector<32x128xbf16>
    %cst = arith.constant dense<0.000000e+00> : vector<8x128xf32>
    %3 = tpu.matmul %1, %2, %cst {dimension_numbers = #tpu.dot_dimension_numbers<[1], [0], [0], [1], [0, 0, 1, 1], [], []>} : vector<8x32xbf16>, vector<32x128xbf16>, vector<8x128xf32> -> vector<8x128xf32>
    %c0_3 = arith.constant 0 : index
    %c0_4 = arith.constant 0 : index
    %4 = vector.load %arg3[%c0_3, %c0_4] : memref<1x128xf32, #tpu.memory_space<vmem>>, vector<1x128xf32>
    %5 = vector.broadcast %4 : vector<1x128xf32> to vector<8x128xf32>
    %6 = arith.addf %3, %5 : vector<8x128xf32>
    %cst_5 = arith.constant 0.000000e+00 : f32
    %7 = vector.broadcast %cst_5 : f32 to vector<8x128xf32>
    %8 = arith.maximumf %6, %7 : vector<8x128xf32>
    %9 = arith.truncf %8 : vector<8x128xf32> to vector<8x128xbf16>
    %c0_6 = arith.constant 0 : index
    %c0_7 = arith.constant 0 : index
    %10 = vector.load %arg4[%c0_6, %c0_7] : memref<128x128xbf16, #tpu.memory_space<vmem>>, vector<128x128xbf16>
    %cst_8 = arith.constant dense<0.000000e+00> : vector<8x128xf32>
    %11 = tpu.matmul %9, %10, %cst_8 {dimension_numbers = #tpu.dot_dimension_numbers<[1], [0], [0], [1], [0, 0, 1, 1], [], []>} : vector<8x128xbf16>, vector<128x128xbf16>, vector<8x128xf32> -> vector<8x128xf32>
    %c0_9 = arith.constant 0 : index
    %c0_10 = arith.constant 0 : index
    %12 = vector.load %arg5[%c0_9, %c0_10] : memref<1x128xf32, #tpu.memory_space<vmem>>, vector<1x128xf32>
    %13 = vector.broadcast %12 : vector<1x128xf32> to vector<8x128xf32>
    %14 = arith.addf %11, %13 : vector<8x128xf32>
    %15 = tpu.iota {dimensions = array<i32: 1>} : vector<8x128xi32>
    %c2_i32 = arith.constant 2 : i32
    %16 = vector.broadcast %c2_i32 : i32 to vector<8x128xi32>
    %17 = arith.cmpi slt, %15, %16 : vector<8x128xi32>
    %cst_11 = arith.constant 0xFF800000 : f32
    %18 = vector.broadcast %cst_11 : f32 to vector<8x128xf32>
    %19 = arith.select %17, %14, %18 : vector<8x128xi1>, vector<8x128xf32>
    %cst_12 = arith.constant dense<0xFF800000> : vector<8xf32>
    %20 = vector.multi_reduction <maximumf>, %19, %cst_12 [1] : vector<8x128xf32> to vector<8xf32>
    %21 = vector.shape_cast %20 : vector<8xf32> to vector<8x1xf32>
    %22 = vector.broadcast %21 : vector<8x1xf32> to vector<8x128xf32>
    %23 = arith.subf %19, %22 : vector<8x128xf32>
    %24 = math.exp %23 : vector<8x128xf32>
    %cst_13 = arith.constant dense<0.000000e+00> : vector<8xf32>
    %25 = vector.multi_reduction <add>, %24, %cst_13 [1] : vector<8x128xf32> to vector<8xf32>
    %26 = vector.shape_cast %25 : vector<8xf32> to vector<8x1xf32>
    %27 = tpu.reciprocal %26 : vector<8x1xf32> -> vector<8x1xf32>
    %28 = vector.broadcast %27 : vector<8x1xf32> to vector<8x128xf32>
    %29 = arith.mulf %24, %28 : vector<8x128xf32>
    %30 = tpu.iota {dimensions = array<i32: 1>} : vector<8x128xi32>
    %c2_i32_14 = arith.constant 2 : i32
    %31 = vector.broadcast %c2_i32_14 : i32 to vector<8x128xi32>
    %32 = arith.cmpi eq, %30, %31 : vector<8x128xi32>
    %33 = math.tanh %14 : vector<8x128xf32>
    %34 = arith.select %32, %33, %29 : vector<8x128xi1>, vector<8x128xf32>
    %c0_15 = arith.constant 0 : index
    %c0_16 = arith.constant 0 : index
    %35 = vector.load %arg6[%c0_15, %c0_16] : memref<8x128xf32, #tpu.memory_space<vmem>>, vector<8x128xf32>
    tpu.vector_store %arg6[%c0_15, %c0_16], %34 {strides = array<i32>} : memref<8x128xf32, #tpu.memory_space<vmem>>, vector<8x128xf32>,
    return
  }
  func.func @transform_0(%arg0: i32) -> (i32, i32) {
    %c0_i32 = arith.constant 0 : i32
    %c0_i32_0 = arith.constant 0 : i32
    return %arg0, %c0_i32 : i32, i32
  }
  func.func @transform_1(%arg0: i32) -> (i32, i32) {
    %c0_i32 = arith.constant 0 : i32
    %c0_i32_0 = arith.constant 0 : i32
    %c0_i32_1 = arith.constant 0 : i32
    return %c0_i32, %c0_i32_0 : i32, i32
  }
  func.func @transform_2(%arg0: i32) -> (i32, i32) {
    %c0_i32 = arith.constant 0 : i32
    %c0_i32_0 = arith.constant 0 : i32
    %c0_i32_1 = arith.constant 0 : i32
    return %c0_i32, %c0_i32_0 : i32, i32
  }
  func.func @transform_3(%arg0: i32) -> (i32, i32) {
    %c0_i32 = arith.constant 0 : i32
    %c0_i32_0 = arith.constant 0 : i32
    %c0_i32_1 = arith.constant 0 : i32
    return %c0_i32, %c0_i32_0 : i32, i32
  }
  func.func @transform_4(%arg0: i32) -> (i32, i32) {
    %c0_i32 = arith.constant 0 : i32
    %c0_i32_0 = arith.constant 0 : i32
    %c0_i32_1 = arith.constant 0 : i32
    return %c0_i32, %c0_i32_0 : i32, i32
  }
  func.func @transform_5(%arg0: i32) -> (i32, i32) {
    %c0_i32 = arith.constant 0 : i32
    %c0_i32_0 = arith.constant 0 : i32
    return %arg0, %c0_i32 : i32, i32
  }
}

</mosaic_0001>

<bundles_post_ra>
// kernel: mcts_forward.1
= control target key start
LH: loop header
LB: loop body
LE: loop exit
PB: predicated region body
PF: predicated region fallthrough
CT: control target
= control target key end

     0   :  { %v295_v0 = vmov 0.0   ;;  %vm296_vm0 = vmmov 0   ;;  %vm46_vm1 = vcmask 261120   ;;  %v203_v21 = vlaneseq  ;;  %s369_s1 = inlined_call_operand.vmem [shape: bf16[32,128], index: 1, kind: input, shape index: {}]   ;;  %s370_s0 = inlined_call_operand.vmem [shape: f32[8,32], index: 0, kind: input, shape index: {}]   ;;  %s371_s3 = inlined_call_operand.vmem [shape: bf16[128,128], index: 3, kind: input, shape index: {}]   ;;  %s372_s2 = inlined_call_operand.vmem [shape: f32[1,128], index: 2, kind: input, shape index: {}]   ;;  %s373_s4 = inlined_call_operand.vmem [shape: f32[1,128], index: 4, kind: input, shape index: {}]   ;;  %s374_s5 = inlined_call_operand.vmem [shape: f32[8,128], index: 5, kind: output, shape index: {}]  }
   0x1   :  { %249 = vmatprep.subr.bf16.mxu0 %v295_v0  ;;  %v279_v1 = vld [vmem:[%s369_s1 + $0x8] sm:$0xff]   ;;  %253 = vmatprep.mubr.msk.bf16.mxu0 %vm296_vm0, %v295_v0  ;;  %v280_v2 = vld [vmem:[%s369_s1] sm:$0xff]   ;;  %v281_v4 = vld [vmem:[%s371_s3 + $0x38] sm:$0xff]  }
   0x2   :  { %257 = vmatprep.subr.bf16.mxu1 %v295_v0  ;;  %273 = vmatprep.mubr.msk.bf16.mxu1 %vm296_vm0, %v295_v0  ;;  %v21_v3 = vld [vmem:[%s370_s0] sm:$0xff]  ;;  %v282_v6 = vld [vmem:[%s371_s3 + $0x30] sm:$0xff]   ;;  %v283_v7 = vld [vmem:[%s371_s3 + $0x28] sm:$0xff]   ;;  %v204_v22 = vand.u32 127, %v203_v21 }
   0x3   :  { %250 = vmatpush3.bf16.msra.mxu0 %v279_v1  ;;  %v22_v5 = vpack.c.bf16 %v21_v3, %v21_v3  ;;  %258 = vmatpush3.bf16.msra.mxu1 %v281_v4  ;;  %v284_v8 = vld [vmem:[%s371_s3 + $0x20] sm:$0xff]   ;;  %v285_v9 = vld [vmem:[%s371_s3 + $0x18] sm:$0xff]   ;;  %v286_v10 = vld [vmem:[%s371_s3 + $0x10] sm:$0xff]  }
   0x4   :  { %251 = vmatprep.subr.bf16.mxu0 %v295_v0  ;;  %259 = vmatprep.subr.bf16.mxu1 %v295_v0  ;;  %v287_v11 = vld [vmem:[%s371_s3 + $0x8] sm:$0xff]   ;;  %v288_v12 = vld [vmem:[%s371_s3] sm:$0xff]   ;;  %vm205_vm2 = vcmp.lt.s32.totalorder %v204_v22, 2  ;;  %vm216_vm3 = vcmp.eq.s32.totalorder %v204_v22, 2 }
   0x5   :  { %v224_v13 = vld [vmem:[%s372_s2] ss:$0 sm:$0xff] }
   0x6   :  { %v228_v23 = vld [vmem:[%s373_s4] ss:$0 sm:$0xff] }
   0x7   :  { %252 = vmatpush3.bf16.msra.mxu0 %v280_v2  ;;  %260 = vmatpush3.bf16.msra.mxu1 %v282_v6 }
   0x8   :  { %261 = vmatprep.subr.bf16.mxu1 %v295_v0 }
   0xa   :  { %254 = vmatmul.mubr.msk.bf16.vlgmr.msra.gmra.mxu0 %vm46_vm1, %v22_v5 }
   0xb   :  { %262 = vmatpush3.bf16.msra.mxu1 %v283_v7 }
   0xc   :  { %263 = vmatprep.subr.bf16.mxu1 %v295_v0 }
   0xf   :  { %264 = vmatpush3.bf16.msra.mxu1 %v284_v8 }
  0x10   :  { %265 = vmatprep.subr.bf16.mxu1 %v295_v0 }
  0x13   :  { %266 = vmatpush3.bf16.msra.mxu1 %v285_v9 }
  0x14   :  { %267 = vmatprep.subr.bf16.mxu1 %v295_v0 }
  0x17   :  { %268 = vmatpush3.bf16.msra.mxu1 %v286_v10 }
  0x18   :  { %269 = vmatprep.subr.bf16.mxu1 %v295_v0 }
  0x1b   :  { %270 = vmatpush3.bf16.msra.mxu1 %v287_v11 }
  0x1c   :  { %271 = vmatprep.subr.bf16.mxu1 %v295_v0 }
  0x1f   :  { %272 = vmatpush3.bf16.msra.mxu1 %v288_v12 }
  0xca   :  { %v84_v14 = vpop.f32.mrf.mxu0 }
  0xcb   :  { %v85_v15 = vadd.f32 %v224_v13, %v84_v14 }
  0xcc   :  { %v255_v16 = vpop.f32.mrf.mxu0 }
  0xcd   :  { %v90_v17 = vmax.f32 %v85_v15, 0.0 }
  0xce   :  { %v87_v18 = vpop.f32.mrf.mxu0 }
  0xcf   :  { %v91_v19 = vpack.c.bf16 %v90_v17, %v90_v17 }
  0xd0   :  { %v256_v20 = vpop.f32.mrf.mxu0 }
  0xd1   :  { %274 = vmatmul.mubr.bf16.vlgmr.msra.gmra.mxu1 %v91_v19 }
 0x191   :  { %v197_v24 = vpop.f32.mrf.mxu1 }
 0x192   :  { %v198_v25 = vadd.f32 %v228_v23, %v197_v24 }
 0x193   :  { %v275_v26 = vpop.f32.mrf.mxu1 }
 0x194   :  { %v206_v27 = vsel %vm205_vm2, %v198_v25, -inf }
 0x195   :  { %207 = vmax.xlane.f32.xlu0 %v206_v27  ;;  %v200_v28 = vpop.f32.mrf.mxu1 }
 0x197   :  { %v276_v29 = vpop.f32.mrf.mxu1 }
 0x21e   :  { %v208_v30 = vpop.xlane.xlu0 %207 }
 0x21f   :  { %v209_v31 = vsub.f32 %v206_v27, %v208_v30 }
 0x221   :  { %v210_v32 = vmul.f32 1.442695, %v209_v31 }
 0x223   :  { %289 = vpow2.f32 %v210_v32 }
 0x230   :  { %v290_v33 = vpop.eup %289 }
 0x231   :  { %212 = vadd.xlane.f32.xlu0 %v290_v33 }
 0x2ba   :  { %v213_v34 = vpop.xlane.xlu0 %212 }
 0x2bb   :  { %291 = vrcp.f32 %v213_v34 }
 0x2bc   :  { %293 = vtanh.f32 %v198_v25 }
 0x2c8   :  { %v292_v35 = vpop.eup %291 }
 0x2c9   :  { %v215_v36 = vmul.f32 %v292_v35, %v290_v33  ;;  %v294_v37 = vpop.eup %293 }
 0x2cb   :  { %v218_v38 = vsel %vm216_vm3, %v294_v37, %v215_v36 }
 0x2cc   :  { %219 = vst [vmem:[%s374_s5] sm:$0xff] %v218_v38 }

</bundles_post_ra>
